<compile_context>
chip_gen: v7x
topology: tpu7x:2x2x1
jax: 0.10.0
libtpu: 0.0.40
codegen_flags: <defaults>
</compile_context>

<pallas_src>
import functools
import math

import jax
import jax.numpy as jnp
from jax.experimental import pallas as pl
from jax.experimental.pallas import tpu as pltpu


# ----------------------------------------------------------------------------
# Kernels
# ----------------------------------------------------------------------------
def _scale_kernel(inv_scale, x_ref, o_ref):
    # inv_scale: static Python float baked at trace time.
    # x_ref/o_ref: (TB, TC) lane-dense block.
    x = x_ref[...].astype(jnp.float32)
    o_ref[...] = (x * inv_scale).astype(o_ref.dtype)


def _normalize_kernel(x_ref, mean_ref, inv_std_ref, o_ref):
    # x_ref/o_ref: (TB, TC) block of TB batch rows, TC pixel columns.
    # mean_ref / inv_std_ref: (1, TC) stats, resident across the inner batch loop.
    x = x_ref[...].astype(jnp.float32)
    o_ref[...] = ((x - mean_ref[...]) * inv_std_ref[...]).astype(o_ref.dtype)


# ----------------------------------------------------------------------------
# Helpers
# ----------------------------------------------------------------------------
_SUBLANE_MULT = {1: 32, 2: 16, 4: 8}  # packed-dtype sublane multiples


def _round_up(x, m):
    return ((x + m - 1) // m) * m


def _block_budget():
    """Per-buffer block bytes + scoped VMEM limit, tuned per chip generation."""
    try:
        vmem = int(pltpu.get_tpu_info().vmem_capacity_bytes)
    except Exception:  # pragma: no cover - conservative fallback
        vmem = 0
    if vmem and vmem <= (64 << 20):
        # v7x-class: 64 MiB physical VMEM, 3.2 TB/s HBM -> bigger blocks pay off.
        # 8 MiB in + 8 MiB out, double-buffered = 32 MiB < 48 MiB limit < 64 MiB.
        return 8 << 20, 48 << 20
    # v5e / v6e (128 MiB physical VMEM): 4 MiB blocks, 16 MiB double-buffered,
    # raise the scoped limit above v5e's 16 MiB default.
    return 4 << 20, 32 << 20


def _choose_blocks(rows, cols, in_dtype, out_dtype, target_bytes):
    """Pick (TB, TC) so each VMEM buffer is <= target_bytes and layout-legal."""
    in_size = jnp.dtype(in_dtype).itemsize
    out_size = jnp.dtype(out_dtype).itemsize
    sub_mult = max(_SUBLANE_MULT.get(in_size, 8), _SUBLANE_MULT.get(out_size, 8))

    # Element budget sized by the widest per-element footprint so neither the
    # input nor the output block exceeds target_bytes.
    elems = max(128 * sub_mult, target_bytes // max(in_size, out_size))

    if cols <= elems // sub_mult:
        tc = cols                                  # full lane extent (always legal)
    else:
        tc = max(128, ((elems // sub_mult) // 128) * 128)  # multiple of 128

    tb = elems // max(tc, 1)
    tb = max(sub_mult, (tb // sub_mult) * sub_mult)
    if tb >= rows:
        tb = rows                                  # full row extent (always legal)

    # Keep >=2 grid steps when the array is big enough, so megacore sharding
    # and DMA/compute overlap have something to work with.
    if pl.cdiv(rows, tb) * pl.cdiv(cols, tc) == 1 and rows >= 2 * sub_mult:
        tb = _round_up(pl.cdiv(rows, 2), sub_mult)
    return tb, tc


# ----------------------------------------------------------------------------
# Paths
# ----------------------------------------------------------------------------
def _scale_path(img, ob_scale, out_dtype):
    orig_shape = img.shape
    if img.ndim >= 2:
        rows = orig_shape[0]
        cols = math.prod(orig_shape[1:])
    else:
        rows, cols = 1, max(1, math.prod(orig_shape))
    x2 = img.reshape(rows, cols)                   # contiguous -> free reshape

    target_bytes, vmem_limit = _block_budget()
    tb, tc = _choose_blocks(rows, cols, x2.dtype, out_dtype, target_bytes)
    grid = (pl.cdiv(cols, tc), pl.cdiv(rows, tb))  # (outer: cols, inner: rows)

    spec = pl.BlockSpec((tb, tc), lambda j, i: (i, j))
    inv_scale = float(1.0 / ob_scale)              # static Python float

    out = pl.pallas_call(
        functools.partial(_scale_kernel, inv_scale),
        out_shape=jax.ShapeDtypeStruct((rows, cols), out_dtype),
        grid=grid,
        in_specs=[spec],
        out_specs=spec,
        compiler_params=pltpu.CompilerParams(
            dimension_semantics=("parallel", "parallel"),
            vmem_limit_bytes=vmem_limit,
        ),
    )(x2)
    return out.reshape(orig_shape)


def _normalize_path(img, img_mean, img_std, out_dtype):
    B = img.shape[0]
    hwc = math.prod(img.shape[1:])
    x2 = img.reshape(B, hwc)                       # contiguous -> free reshape

    # Stats math in f32; reciprocal of std paid once here, not per element.
    mean = jnp.asarray(img_mean, jnp.float32).reshape(1, hwc)
    inv_std = (1.0 / jnp.asarray(img_std, jnp.float32)).reshape(1, hwc)

    target_bytes, vmem_limit = _block_budget()
    tb, tc = _choose_blocks(B, hwc, x2.dtype, out_dtype, target_bytes)
    # Pixel-tile index j on the OUTER axis so the (1, TC) stat blocks are
    # DMA'd once per pixel tile and stay resident across the inner batch loop.
    grid = (pl.cdiv(hwc, tc), pl.cdiv(B, tb))

    x_spec = pl.BlockSpec((tb, tc), lambda j, i: (i, j))
    stat_spec = pl.BlockSpec((1, tc), lambda j, i: (0, j))

    out = pl.pallas_call(
        _normalize_kernel,
        out_shape=jax.ShapeDtypeStruct((B, hwc), out_dtype),
        grid=grid,
        in_specs=[x_spec, stat_spec, stat_spec],
        out_specs=x_spec,
        compiler_params=pltpu.CompilerParams(
            dimension_semantics=("parallel", "parallel"),
            vmem_limit_bytes=vmem_limit,
        ),
    )(x2, mean, inv_std)
    return out.reshape(img.shape)


# ----------------------------------------------------------------------------
# Wrapper (mirrors ImgPreprocessing.forward)
# ----------------------------------------------------------------------------
def img_preprocessing(img, img_mean=None, img_std=None, scale_img=True,
                      out_dtype=None):
    """JAX/Pallas equivalent of ImgPreprocessing.forward.

    img:       (B, H, W, C) array (float or uint8)
    img_mean:  optional (H, W, C) mean image  (the npz 'mean')
    img_std:   optional (H, W, C) std image   (the npz 'std')
    scale_img: if mean/std are None, divide by 255.0 when True, else by 1.0
    out_dtype: output dtype; defaults to img.dtype for float inputs, float32
               for integer inputs. Pass jnp.bfloat16 to halve write-side HBM
               traffic when the downstream model consumes bf16.
    """
    if out_dtype is None:
        out_dtype = (img.dtype if jnp.issubdtype(img.dtype, jnp.floating)
                     else jnp.float32)

    if img_mean is not None:
        return _normalize_path(img, img_mean, img_std, out_dtype)

    ob_scale = 255.0 if scale_img else 1.0
    if ob_scale == 1.0:
        # No-op scaling: skip the kernel entirely (saves a full HBM round trip).
        return img.astype(out_dtype)
    return _scale_path(img, ob_scale, out_dtype)


# ----------------------------------------------------------------------------
# Main
# ----------------------------------------------------------------------------
if __name__ == "__main__":
    key = jax.random.PRNGKey(0)
    k_img, k_mean, k_std = jax.random.split(key, 3)

    B, H, W, C = 2, 16, 16, 4
    # Raw images in [0, 255] as the module expects when scale_img=True.
    img = jax.random.uniform(k_img, (B, H, W, C), jnp.float32, 0.0, 255.0)

    # --- path 1: img_statistics=None, scale_img=True (default module config) ---
    out_scale = jax.block_until_ready(img_preprocessing(img, scale_img=True))
    assert out_scale.shape == (B, H, W, C)
    assert jnp.allclose(out_scale, img / 255.0, atol=1e-6), "scale path mismatch"

    # --- path 1b: uint8 input -> float32 output (reduced HBM read bytes) ---
    img_u8 = img.astype(jnp.uint8)
    out_u8 = jax.block_until_ready(img_preprocessing(img_u8, scale_img=True))
    assert out_u8.dtype == jnp.float32
    assert jnp.allclose(out_u8, img_u8.astype(jnp.float32) / 255.0,
                        atol=1e-6), "uint8 scale path mismatch"

    # --- path 1c: scale_img=False -> kernel-free short circuit ---
    out_id = jax.block_until_ready(img_preprocessing(img, scale_img=False))
    assert jnp.allclose(out_id, img, atol=1e-6), "identity scale mismatch"

    # --- path 2: img_statistics provided (synthetic mean/std) ---
    img_mean = jax.random.uniform(k_mean, (H, W, C), jnp.float32, 0.0, 1.0)
    img_std = jax.random.uniform(k_std, (H, W, C), jnp.float32, 0.5, 1.5)
    img01 = img / 255.0  # module assumes [0,1] input when stats are used
    out_norm = jax.block_until_ready(
        img_preprocessing(img01, img_mean=img_mean, img_std=img_std))
    ref_norm = (img01 - img_mean[None]) / img_std[None]
    assert jnp.allclose(out_norm, ref_norm, atol=1e-5), "normalize path mismatch"

    # --- path 2b: odd shape (not multiples of 8/128) to exercise full-dim blocks ---
    B2, H2, W2, C2 = 3, 17, 13, 3  # hwc = 663
    img2 = jax.random.uniform(k_img, (B2, H2, W2, C2), jnp.float32, 0.0, 1.0)
    mean2 = jax.random.uniform(k_mean, (H2, W2, C2), jnp.float32, 0.0, 1.0)
    std2 = jax.random.uniform(k_std, (H2, W2, C2), jnp.float32, 0.5, 1.5)
    out2 = jax.block_until_ready(
        img_preprocessing(img2, img_mean=mean2, img_std=std2))
    ref2 = (img2 - mean2[None]) / std2[None]
    assert jnp.allclose(out2, ref2, atol=1e-5), "odd-shape normalize mismatch"

    print("KERNEL_OK")
</pallas_src>

<mosaic_0001>
module attributes {stable_mosaic.version = 11 : i64} {
  func.func @_scale_kernel(%arg0: i32, %arg1: i32, %arg2: memref<2x1024xf32, #tpu.memory_space<vmem>>, %arg3: memref<2x1024xf32, #tpu.memory_space<vmem>>) attributes {dimension_semantics = [#tpu.dimension_semantics<parallel>, #tpu.dimension_semantics<parallel>], iteration_bounds = array<i64: 1, 1>, scalar_prefetch = 0 : i64, scratch_operands = 0 : i64, tpu.core_type = #tpu.core_type<tc>, window_params = [{transform_indices = @transform_0, window_bounds = array<i64: 2, 1024>}, {transform_indices = @transform_1, window_bounds = array<i64: 2, 1024>}]} {
    %c0 = arith.constant 0 : index
    %c0_0 = arith.constant 0 : index
    %0 = vector.load %arg2[%c0, %c0_0] : memref<2x1024xf32, #tpu.memory_space<vmem>>, vector<2x1024xf32>
    %cst = arith.constant 0.00392156886 : f32
    %1 = vector.broadcast %cst : f32 to vector<2x1024xf32>
    %2 = arith.mulf %0, %1 : vector<2x1024xf32>
    %c0_1 = arith.constant 0 : index
    %c0_2 = arith.constant 0 : index
    %3 = vector.load %arg3[%c0_1, %c0_2] : memref<2x1024xf32, #tpu.memory_space<vmem>>, vector<2x1024xf32>
    tpu.vector_store %arg3[%c0_1, %c0_2], %2 {strides = array<i32>} : memref<2x1024xf32, #tpu.memory_space<vmem>>, vector<2x1024xf32>,
    return
  }
  func.func @transform_0(%arg0: i32, %arg1: i32) -> (i32, i32) {
    %c0_i32 = arith.constant 0 : i32
    return %arg1, %arg0 : i32, i32
  }
  func.func @transform_1(%arg0: i32, %arg1: i32) -> (i32, i32) {
    %c0_i32 = arith.constant 0 : i32
    return %arg1, %arg0 : i32, i32
  }
}

</mosaic_0001>

<bundles_post_ra>
// kernel: tpu_custom_call.1
= control target key start
LH: loop header
LB: loop body
LE: loop exit
PB: predicated region body
PF: predicated region fallthrough
CT: control target
= control target key end

     0   :  { %6 = vsyncpa [#allocation3], 0  ;;  %s128_s0 = inlined_call_operand.hbm [shape: f32[2,1024], index: 0, kind: input, shape index: {}]   ;;  %s129_s1 = inlined_call_operand.hbm [shape: f32[2,1024], index: 1, kind: output, shape index: {}]  }
   0x1   :  { %7 = vsyncpa [#allocation4], 0  ;;  %s92_s6 = smov [#allocation2]   ;;  %s44_s10 = scalar_lea.hbm %s128_s0, 256 }
   0x2   :  { %s14_s7 = sshll.u32 %s92_s6, 4  ;;  %p45_p0 = scmp.ne.s32.totalorder %s128_s0, %s44_s10  ;;  %s15_s7 = int_to_ptr.vmem [resolvable:$true] %s14_s7 }
   0x3   :  { %p48_p1 = scmp.lt.u32.totalorder %s44_s10, %s128_s0 }
   0x5   :  { %p50_p2 = pnand %p48_p1, %p45_p0 }
   0x7   :  { %53 = shalt.err (!%p50_p2)
}
   0x8   :  { %s54_s15 = scalar_lea.vmem %s15_s7, 256  ;;  %p59_p4 = scmp.lt.s32.totalorder %s15_s7, %s15_s7 }
   0x9   :  { %p55_p3 = scmp.ne.s32.totalorder %s15_s7, %s54_s15  ;;  %p60_p5 = scmp.lt.s32.totalorder %s54_s15, %s54_s15 }
   0xb   :  { %p61_p6 = por %p60_p5, %p59_p4 }
   0xd   :  { %p62_p7 = pnand %p61_p6, %p55_p3 }
   0xf   :  { %65 = shalt.err (!%p62_p7)
}
  0x10   :  { %17 = dma.hbm_to_vmem [thread:$0]  %s128_s0, 256, %s15_s7, [#allocation3]  }
  0x11   :  { %88 = dma.done.wait [#allocation3], 256  }
  0x12   :  { %89 = vsyncadd [#allocation3], 4294967040  ;;  %s93_s18 = smov [#allocation5]   ;;  %v21_v0 = vld [vmem:[#allocation2] sm:$0xff]  ;;  %v22_v1 = vld [vmem:[#allocation2 + $0x8] sm:$0xff] }
  0x13   :  { %s33_s19 = sshll.u32 %s93_s18, 4  ;;  %v23_v2 = vmul.f32 0.003921569, %v21_v0  ;;  %v24_v3 = vmul.f32 0.003921569, %v22_v1  ;;  %s34_s19 = int_to_ptr.vmem [resolvable:$true] %s33_s19 }
  0x14   :  { %s66_s20 = scalar_lea.vmem %s34_s19, 256  ;;  %p71_p9 = scmp.lt.s32.totalorder %s34_s19, %s34_s19 }
  0x15   :  { %25 = vst [vmem:[#allocation5] sm:$0xff] %v23_v2  ;;  %26 = vst [vmem:[#allocation5 + $0x8] sm:$0xff] %v24_v3  ;;  %p67_p8 = scmp.ne.s32.totalorder %s34_s19, %s66_s20  ;;  %p72_p10 = scmp.lt.s32.totalorder %s66_s20, %s66_s20 }
  0x17   :  { %p73_p11 = por %p72_p10, %p71_p9 }
  0x19   :  { %p74_p12 = pnand %p73_p11, %p67_p8 }
  0x1b   :  { %77 = shalt.err (!%p74_p12)
}
  0x1c   :  { %s78_s22 = scalar_lea.hbm %s129_s1, 256 }
  0x1d   :  { %p79_p13 = scmp.ne.s32.totalorder %s129_s1, %s78_s22  ;;  %p82_p0 = scmp.lt.u32.totalorder %s78_s22, %s129_s1 }
  0x1f   :  { %p84_p1 = pnand %p82_p0, %p79_p13 }
  0x21   :  { %87 = shalt.err (!%p84_p1)
}
  0x22   :  { %36 = dma.vmem_to_hbm [thread:$0]  %s34_s19, 256, %s129_s1, [#allocation4]  }
  0x23   :  { %90 = dma.done.wait [#allocation4], 256  }
  0x24   :  { %91 = vsyncadd [#allocation4], 4294967040 }
  0x25   :  { %40 = vsyncpa [#allocation3], 1 }
  0x26   :  { %41 = vsyncpa [#allocation4], 1 }

</bundles_post_ra>
